<compile_context>
chip_gen: v6e
topology: v6e:2x2x1
jax: 0.10.0
libtpu: 0.0.40
codegen_flags: <defaults>
</compile_context>

<pallas_src>
import math
import functools

import jax
import jax.numpy as jnp
from jax import lax
from jax.experimental import pallas as pl
from jax.experimental.pallas import tpu as pltpu

_INV_SQRT2 = 1.0 / math.sqrt(2.0)


def _exact_gelu(x):
    # nn.GELU() default = exact erf-based GELU (computed in f32).
    return 0.5 * x * (1.0 + lax.erf(x * _INV_SQRT2))


def _round_up(x, m):
    return (x + m - 1) // m * m


def _vmem_limit(cin, cout, chid, tm, chunk, act_itemsize, w_itemsize):
    # double-buffered x/out tiles + resident weights (+pipeline copies)
    # + f32 accumulator + live h chunk.  Cap under v7x's 64 MiB physical VMEM.
    est = (2 * cin * tm * act_itemsize
           + 2 * cout * tm * act_itemsize
           + 2 * (chid * cin + cout * chid + chid + cout + 2 * cin) * w_itemsize
           + cout * tm * 4
           + 2 * max(chunk, 1) * tm * 4)
    return int(min(56 * 2 ** 20, max(32 * 2 ** 20, 2 * est)))


# ---------------------------------------------------------------------------
# Kernel bodies
# ---------------------------------------------------------------------------

def _mlp_accumulate(xin, w1_ref, b1_ref, w2_ref, acc_ref, chunk):
    """acc_ref[Cout, tm] (f32) <- W2 @ gelu(W1 @ xin + b1), chunked over Chid."""
    chid = w1_ref.shape[0]
    first = True
    for c0 in range(0, chid, chunk):             # static chunking of Chid
        cw = min(chunk, chid - c0)
        # conv1 (1x1x1) on this hidden chunk: [cw, Cin] @ [Cin, tm]
        h = jnp.dot(w1_ref[c0:c0 + cw, :], xin,
                    preferred_element_type=jnp.float32)
        h = _exact_gelu(h + b1_ref[c0:c0 + cw, :].astype(jnp.float32))
        # drop1: p=0 -> identity
        # conv2 partial sum: [Cout, cw] @ [cw, tm]
        contrib = jnp.dot(w2_ref[:, c0:c0 + cw], h.astype(w2_ref.dtype),
                          preferred_element_type=jnp.float32)
        if first:
            acc_ref[...] = contrib
            first = False
        else:
            acc_ref[...] += contrib


def conv_mlp_kernel(x_ref, w1_ref, b1_ref, w2_ref, b2_ref, o_ref, acc_ref, *,
                    chunk):
    # x_ref  : [Cin,  tm]   (spatial voxels on the lane axis -> lane-dense)
    # w1_ref : [Chid, Cin]  b1_ref : [Chid, 1]
    # w2_ref : [Cout, Chid] b2_ref : [Cout, 1]
    # o_ref  : [Cout, tm]   acc_ref: [Cout, tm] f32 scratch accumulator
    xin = x_ref[...].astype(w1_ref.dtype)        # no-op in the pure-f32 path
    _mlp_accumulate(xin, w1_ref, b1_ref, w2_ref, acc_ref, chunk)
    # drop2: p=0 -> identity
    o_ref[...] = (acc_ref[...] + b2_ref[...].astype(jnp.float32)).astype(o_ref.dtype)


def ln_mlp_res_kernel(x_ref, g_ref, be_ref, w1_ref, b1_ref, w2_ref, b2_ref,
                      o_ref, acc_ref, *, chunk, eps):
    # ConvTransBlock MLP branch:  o = x + ConvMlp(LayerNorm_cf(x))
    # x_ref: [C, tm];  g_ref/be_ref: [C, 1];  o_ref: [C, tm]
    x = x_ref[...].astype(jnp.float32)
    # channels_first LayerNorm: normalize over the channel (sublane) axis
    mu = jnp.mean(x, axis=0, keepdims=True)               # [1, tm]
    xc = x - mu
    var = jnp.mean(xc * xc, axis=0, keepdims=True)        # biased, as in torch
    xn = xc * lax.rsqrt(var + eps)
    xn = xn * g_ref[...].astype(jnp.float32) + be_ref[...].astype(jnp.float32)
    _mlp_accumulate(xn.astype(w1_ref.dtype), w1_ref, b1_ref, w2_ref, acc_ref,
                    chunk)
    # residual add (Cout == Cin in ConvTransBlock)
    o_ref[...] = (x + acc_ref[...]
                  + b2_ref[...].astype(jnp.float32)).astype(o_ref.dtype)


def pointwise_conv_kernel(x_ref, w_ref, b_ref, o_ref):
    # 1x1x1 Conv3d (+bias): [Cout, Cin] @ [Cin, tm]
    y = jnp.dot(w_ref[...], x_ref[...].astype(w_ref.dtype),
                preferred_element_type=jnp.float32)
    o_ref[...] = (y + b_ref[...].astype(jnp.float32)).astype(o_ref.dtype)


# ---------------------------------------------------------------------------
# Channels-first [N, C, M] wrappers
# ---------------------------------------------------------------------------

def _tile_and_pad(x3d, tm):
    """Pick a lane tile, zero-pad M up to a multiple of it."""
    N, cin, M = x3d.shape
    tm_eff = min(tm, _round_up(M, 128))
    Mp = _round_up(M, tm_eff)
    if Mp != M:
        x3d = jnp.pad(x3d, ((0, 0), (0, 0), (0, Mp - M)))  # cheap memset DMA
    return x3d, tm_eff, Mp


def conv_mlp_cf(x3d, w1t, b1, w2t, b2, *, tm=512, chid_chunk=512):
    """ConvMlp on channels-first x3d [N, Cin, M] -> [N, Cout, M]."""
    N, cin, M = x3d.shape
    chid, cin2 = w1t.shape
    assert cin2 == cin
    cout = w2t.shape[0]

    x3d, tm_eff, Mp = _tile_and_pad(x3d, tm)
    chunk = max(1, min(chid_chunk, chid))
    grid = (N, Mp // tm_eff)

    vmem_limit = _vmem_limit(cin, cout, chid, tm_eff, chunk,
                             x3d.dtype.itemsize, w1t.dtype.itemsize)
    kernel = functools.partial(conv_mlp_kernel, chunk=chunk)

    y3d = pl.pallas_call(
        kernel,
        out_shape=jax.ShapeDtypeStruct((N, cout, Mp), x3d.dtype),
        grid_spec=pltpu.PrefetchScalarGridSpec(
            num_scalar_prefetch=0,
            grid=grid,
            in_specs=[
                pl.BlockSpec((None, cin, tm_eff), lambda n, i: (n, 0, i)),  # x
                pl.BlockSpec((chid, cin), lambda n, i: (0, 0)),             # w1
                pl.BlockSpec((chid, 1), lambda n, i: (0, 0)),               # b1
                pl.BlockSpec((cout, chid), lambda n, i: (0, 0)),            # w2
                pl.BlockSpec((cout, 1), lambda n, i: (0, 0)),               # b2
            ],
            out_specs=pl.BlockSpec((None, cout, tm_eff), lambda n, i: (n, 0, i)),
            scratch_shapes=[pltpu.VMEM((cout, tm_eff), jnp.float32)],
        ),
        compiler_params=pltpu.CompilerParams(
            dimension_semantics=("parallel", "parallel"),
            vmem_limit_bytes=vmem_limit,
        ),
    )(x3d, w1t, b1, w2t, b2)

    if Mp != M:
        y3d = y3d[:, :, :M]
    return y3d


def ln_mlp_residual_cf(x3d, gamma, beta, w1t, b1, w2t, b2, *, eps=1e-6,
                       tm=512, chid_chunk=512):
    """Fused  x + ConvMlp(LayerNorm_channels_first(x))  on [N, C, M]."""
    N, cin, M = x3d.shape
    chid, cin2 = w1t.shape
    cout = w2t.shape[0]
    assert cin2 == cin and cout == cin  # residual requires matching channels

    x3d, tm_eff, Mp = _tile_and_pad(x3d, tm)
    chunk = max(1, min(chid_chunk, chid))
    grid = (N, Mp // tm_eff)

    vmem_limit = _vmem_limit(cin, cout, chid, tm_eff, chunk,
                             x3d.dtype.itemsize, w1t.dtype.itemsize)
    kernel = functools.partial(ln_mlp_res_kernel, chunk=chunk, eps=float(eps))

    y3d = pl.pallas_call(
        kernel,
        out_shape=jax.ShapeDtypeStruct((N, cout, Mp), x3d.dtype),
        grid_spec=pltpu.PrefetchScalarGridSpec(
            num_scalar_prefetch=0,
            grid=grid,
            in_specs=[
                pl.BlockSpec((None, cin, tm_eff), lambda n, i: (n, 0, i)),  # x
                pl.BlockSpec((cin, 1), lambda n, i: (0, 0)),                # gamma
                pl.BlockSpec((cin, 1), lambda n, i: (0, 0)),                # beta
                pl.BlockSpec((chid, cin), lambda n, i: (0, 0)),             # w1
                pl.BlockSpec((chid, 1), lambda n, i: (0, 0)),               # b1
                pl.BlockSpec((cout, chid), lambda n, i: (0, 0)),            # w2
                pl.BlockSpec((cout, 1), lambda n, i: (0, 0)),               # b2
            ],
            out_specs=pl.BlockSpec((None, cout, tm_eff), lambda n, i: (n, 0, i)),
            scratch_shapes=[pltpu.VMEM((cout, tm_eff), jnp.float32)],
        ),
        compiler_params=pltpu.CompilerParams(
            dimension_semantics=("parallel", "parallel"),
            vmem_limit_bytes=vmem_limit,
        ),
    )(x3d, gamma, beta, w1t, b1, w2t, b2)

    if Mp != M:
        y3d = y3d[:, :, :M]
    return y3d


def pointwise_conv_cf(x3d, w, b, *, tm=512):
    """1x1x1 Conv3d (+bias) on [N, Cin, M] -> [N, Cout, M]."""
    N, cin, M = x3d.shape
    cout, cin2 = w.shape
    assert cin2 == cin

    x3d, tm_eff, Mp = _tile_and_pad(x3d, tm)
    grid = (N, Mp // tm_eff)
    vmem_limit = _vmem_limit(cin, cout, 0, tm_eff, 0,
                             x3d.dtype.itemsize, w.dtype.itemsize)

    y3d = pl.pallas_call(
        pointwise_conv_kernel,
        out_shape=jax.ShapeDtypeStruct((N, cout, Mp), x3d.dtype),
        grid_spec=pltpu.PrefetchScalarGridSpec(
            num_scalar_prefetch=0,
            grid=grid,
            in_specs=[
                pl.BlockSpec((None, cin, tm_eff), lambda n, i: (n, 0, i)),  # x
                pl.BlockSpec((cout, cin), lambda n, i: (0, 0)),             # w
                pl.BlockSpec((cout, 1), lambda n, i: (0, 0)),               # b
            ],
            out_specs=pl.BlockSpec((None, cout, tm_eff), lambda n, i: (n, 0, i)),
        ),
        compiler_params=pltpu.CompilerParams(
            dimension_semantics=("parallel", "parallel"),
            vmem_limit_bytes=vmem_limit,
        ),
    )(x3d, w, b)

    if Mp != M:
        y3d = y3d[:, :, :M]
    return y3d


# ---------------------------------------------------------------------------
# NCDHW front-ends (PyTorch layout) -- reshape only, no transposes
# ---------------------------------------------------------------------------

def conv_mlp_forward(x_ncdhw, params, *, tm=512):
    """ConvMlp.forward.  x_ncdhw: [N, Cin, D, H, W]."""
    w1t, b1, w2t, b2 = params
    N, Cin, D, H, W = x_ncdhw.shape
    Cout = w2t.shape[0]
    y3d = conv_mlp_cf(x_ncdhw.reshape(N, Cin, D * H * W), w1t, b1, w2t, b2,
                      tm=tm)
    return y3d.reshape(N, Cout, D, H, W)


def block_mlp_branch_forward(x_ncdhw, ln_params, mlp_params, *, eps=1e-6,
                             tm=512):
    """ConvTransBlock second line:  x + mlp(norm(x)).  x: [N, C, D, H, W]."""
    gamma, beta = ln_params
    w1t, b1, w2t, b2 = mlp_params
    N, C, D, H, W = x_ncdhw.shape
    y3d = ln_mlp_residual_cf(x_ncdhw.reshape(N, C, D * H * W), gamma, beta,
                             w1t, b1, w2t, b2, eps=eps, tm=tm)
    return y3d.reshape(N, C, D, H, W)


def pointwise_conv3d_forward(x_ncdhw, w, b, *, tm=512):
    """Conv3d(k=1) forward (bottleneck / Attention.proj).  x: [N,Cin,D,H,W]."""
    N, Cin, D, H, W = x_ncdhw.shape
    Cout = w.shape[0]
    y3d = pointwise_conv_cf(x_ncdhw.reshape(N, Cin, D * H * W), w, b, tm=tm)
    return y3d.reshape(N, Cout, D, H, W)


# ---------------------------------------------------------------------------
# Parameter init + pure-JAX references
# ---------------------------------------------------------------------------

def init_mlp_params(key, in_features, hidden_features=None, out_features=None,
                    dtype=jnp.float32):
    """Shapes match Conv3d(k=1) weights squeezed: w1t [Chid,Cin], w2t [Cout,Chid];
    biases as column vectors for lane-broadcast."""
    hidden_features = hidden_features or in_features
    out_features = out_features or in_features
    k1, k2, k3, k4 = jax.random.split(key, 4)
    s1 = 1.0 / math.sqrt(in_features)
    s2 = 1.0 / math.sqrt(hidden_features)
    w1t = jax.random.uniform(k1, (hidden_features, in_features), dtype, -s1, s1)
    b1 = jax.random.uniform(k2, (hidden_features, 1), dtype, -s1, s1)
    w2t = jax.random.uniform(k3, (out_features, hidden_features), dtype, -s2, s2)
    b2 = jax.random.uniform(k4, (out_features, 1), dtype, -s2, s2)
    return w1t, b1, w2t, b2


def init_ln_params(key, dim, dtype=jnp.float32):
    kg, kb = jax.random.split(key)
    gamma = 1.0 + 0.1 * jax.random.normal(kg, (dim, 1), dtype)
    beta = 0.1 * jax.random.normal(kb, (dim, 1), dtype)
    return gamma, beta


def _ref_conv_mlp(x, params):
    w1t, b1, w2t, b2 = (jnp.asarray(p, jnp.float32) for p in params)
    x = x.astype(jnp.float32)
    h = jnp.einsum("oc,ncxyz->noxyz", w1t, x) + b1.reshape(1, -1, 1, 1, 1)
    h = 0.5 * h * (1.0 + lax.erf(h * _INV_SQRT2))
    return jnp.einsum("oc,ncxyz->noxyz", w2t, h) + b2.reshape(1, -1, 1, 1, 1)


def _ref_ln_cf(x, gamma, beta, eps=1e-6):
    x = x.astype(jnp.float32)
    u = x.mean(axis=1, keepdims=True)
    s = ((x - u) ** 2).mean(axis=1, keepdims=True)
    xn = (x - u) / jnp.sqrt(s + eps)
    g = jnp.asarray(gamma, jnp.float32).reshape(1, -1, 1, 1, 1)
    b = jnp.asarray(beta, jnp.float32).reshape(1, -1, 1, 1, 1)
    return g * xn + b


def _ref_block_mlp_branch(x, ln_params, mlp_params, eps=1e-6):
    gamma, beta = ln_params
    return x.astype(jnp.float32) + _ref_conv_mlp(_ref_ln_cf(x, gamma, beta, eps),
                                                 mlp_params)


def _ref_pointwise(x, w, b):
    x = x.astype(jnp.float32)
    w = jnp.asarray(w, jnp.float32)
    b = jnp.asarray(b, jnp.float32)
    return jnp.einsum("oc,ncxyz->noxyz", w, x) + b.reshape(1, -1, 1, 1, 1)


# ---------------------------------------------------------------------------
# Self-test
# ---------------------------------------------------------------------------

if __name__ == "__main__":
    key = jax.random.PRNGKey(0)
    kx, kp, kl, kb = jax.random.split(key, 4)

    # Small shapes consistent with a Conv3d-MLP input: N=2, C=4, D=H=8, W=7.
    # M = D*H*W = 448 (not a multiple of the tile) -> exercises the pad path.
    N, C, D, H, W = 2, 4, 8, 8, 7
    hidden = 16
    x = jax.random.normal(kx, (N, C, D, H, W), dtype=jnp.float32)

    mlp_params = init_mlp_params(kp, in_features=C, hidden_features=hidden,
                                 dtype=jnp.float32)
    ln_params = init_ln_params(kl, C, dtype=jnp.float32)
    wb = jax.random.uniform(kb, (8, C), jnp.float32, -0.5, 0.5)     # bottleneck
    bb = jax.random.uniform(jax.random.fold_in(kb, 1), (8, 1), jnp.float32,
                            -0.5, 0.5)

    # --- 1. ConvMlp (f32, bit-faithful) ---
    fwd_mlp = jax.jit(functools.partial(conv_mlp_forward, tm=512))
    y = fwd_mlp(x, mlp_params)
    jax.block_until_ready(y)
    y_ref = _ref_conv_mlp(x, mlp_params)
    assert y.shape == (N, C, D, H, W)
    assert jnp.allclose(y, y_ref, atol=1e-4, rtol=1e-4)

    # --- 1b. ConvMlp bf16 MXU path (f32 accumulation, f32 bias + GELU) ---
    mlp_bf16 = tuple(p.astype(jnp.bfloat16) for p in mlp_params)
    y16 = fwd_mlp(x.astype(jnp.bfloat16), mlp_bf16)
    jax.block_until_ready(y16)
    assert jnp.allclose(y16.astype(jnp.float32), y_ref, atol=5e-2, rtol=5e-2)

    # --- 2. Fused ConvTransBlock MLP branch: x + mlp(norm_cf(x)) ---
    fwd_blk = jax.jit(functools.partial(block_mlp_branch_forward, tm=512))
    yb = fwd_blk(x, ln_params, mlp_params)
    jax.block_until_ready(yb)
    yb_ref = _ref_block_mlp_branch(x, ln_params, mlp_params)
    assert yb.shape == (N, C, D, H, W)
    assert jnp.allclose(yb, yb_ref, atol=1e-3, rtol=1e-3)

    # --- 3. Pointwise Conv3d (bottleneck / proj) ---
    fwd_pw = jax.jit(functools.partial(pointwise_conv3d_forward, tm=512))
    yp = fwd_pw(x, wb, bb)
    jax.block_until_ready(yp)
    yp_ref = _ref_pointwise(x, wb, bb)
    assert yp.shape == (N, 8, D, H, W)
    assert jnp.allclose(yp, yp_ref, atol=1e-4, rtol=1e-4)

    print("KERNEL_OK")
</pallas_src>

<mosaic_0001>
module attributes {stable_mosaic.version = 11 : i64} {
  func.func @conv_mlp_kernel(%arg0: i32, %arg1: i32, %arg2: memref<1x4x512xf32, #tpu.memory_space<vmem>>, %arg3: memref<16x4xf32, #tpu.memory_space<vmem>>, %arg4: memref<16x1xf32, #tpu.memory_space<vmem>>, %arg5: memref<4x16xf32, #tpu.memory_space<vmem>>, %arg6: memref<4x1xf32, #tpu.memory_space<vmem>>, %arg7: memref<1x4x512xf32, #tpu.memory_space<vmem>>, %arg8: memref<4x512xf32, #tpu.memory_space<vmem>>) attributes {dimension_semantics = [#tpu.dimension_semantics<parallel>, #tpu.dimension_semantics<parallel>], iteration_bounds = array<i64: 2, 1>, scalar_prefetch = 0 : i64, scratch_operands = 1 : i64, tpu.core_type = #tpu.core_type<tc>, window_params = [{transform_indices = @transform_0, window_bounds = array<i64: 1, 4, 512>}, {pipeline_mode = #tpu.pipeline_mode<synchronous>, transform_indices = @transform_1, window_bounds = array<i64: 16, 4>}, {pipeline_mode = #tpu.pipeline_mode<synchronous>, transform_indices = @transform_2, window_bounds = array<i64: 16, 1>}, {pipeline_mode = #tpu.pipeline_mode<synchronous>, transform_indices = @transform_3, window_bounds = array<i64: 4, 16>}, {pipeline_mode = #tpu.pipeline_mode<synchronous>, transform_indices = @transform_4, window_bounds = array<i64: 4, 1>}, {transform_indices = @transform_5, window_bounds = array<i64: 1, 4, 512>}]} {
    %c0 = arith.constant 0 : index
    %c0_0 = arith.constant 0 : index
    %c0_1 = arith.constant 0 : index
    %0 = vector.load %arg2[%c0, %c0_0, %c0_1] : memref<1x4x512xf32, #tpu.memory_space<vmem>>, vector<1x4x512xf32>
    %1 = vector.shape_cast %0 : vector<1x4x512xf32> to vector<4x512xf32>
    %c0_2 = arith.constant 0 : index
    %c0_3 = arith.constant 0 : index
    %2 = vector.load %arg3[%c0_2, %c0_3] : memref<16x4xf32, #tpu.memory_space<vmem>>, vector<16x4xf32>
    %cst = arith.constant dense<0.000000e+00> : vector<16x512xf32>
    %3 = tpu.matmul %2, %1, %cst {dimension_numbers = #tpu.dot_dimension_numbers<[1], [0], [0], [1], [0, 0, 1, 1], [], []>} : vector<16x4xf32>, vector<4x512xf32>, vector<16x512xf32> -> vector<16x512xf32>
    %c0_4 = arith.constant 0 : index
    %c0_5 = arith.constant 0 : index
    %4 = vector.load %arg4[%c0_4, %c0_5] : memref<16x1xf32, #tpu.memory_space<vmem>>, vector<16x1xf32>
    %5 = vector.broadcast %4 : vector<16x1xf32> to vector<16x512xf32>
    %6 = arith.addf %3, %5 : vector<16x512xf32>
    %cst_6 = arith.constant 5.000000e-01 : f32
    %7 = vector.broadcast %cst_6 : f32 to vector<16x512xf32>
    %8 = arith.mulf %7, %6 : vector<16x512xf32>
    %cst_7 = arith.constant 0.707106769 : f32
    %9 = vector.broadcast %cst_7 : f32 to vector<16x512xf32>
    %10 = arith.mulf %6, %9 : vector<16x512xf32>
    %11 = math.erf %10 : vector<16x512xf32>
    %cst_8 = arith.constant 1.000000e+00 : f32
    %12 = vector.broadcast %cst_8 : f32 to vector<16x512xf32>
    %13 = arith.addf %12, %11 : vector<16x512xf32>
    %14 = arith.mulf %8, %13 : vector<16x512xf32>
    %c0_9 = arith.constant 0 : index
    %c0_10 = arith.constant 0 : index
    %15 = vector.load %arg5[%c0_9, %c0_10] : memref<4x16xf32, #tpu.memory_space<vmem>>, vector<4x16xf32>
    %cst_11 = arith.constant dense<0.000000e+00> : vector<4x512xf32>
    %16 = tpu.matmul %15, %14, %cst_11 {dimension_numbers = #tpu.dot_dimension_numbers<[1], [0], [0], [1], [0, 0, 1, 1], [], []>} : vector<4x16xf32>, vector<16x512xf32>, vector<4x512xf32> -> vector<4x512xf32>
    %c0_12 = arith.constant 0 : index
    %c0_13 = arith.constant 0 : index
    %17 = vector.load %arg8[%c0_12, %c0_13] : memref<4x512xf32, #tpu.memory_space<vmem>>, vector<4x512xf32>
    tpu.vector_store %arg8[%c0_12, %c0_13], %16 {strides = array<i32>} : memref<4x512xf32, #tpu.memory_space<vmem>>, vector<4x512xf32>,
    %c0_14 = arith.constant 0 : index
    %c0_15 = arith.constant 0 : index
    %18 = vector.load %arg8[%c0_14, %c0_15] : memref<4x512xf32, #tpu.memory_space<vmem>>, vector<4x512xf32>
    %c0_16 = arith.constant 0 : index
    %c0_17 = arith.constant 0 : index
    %19 = vector.load %arg6[%c0_16, %c0_17] : memref<4x1xf32, #tpu.memory_space<vmem>>, vector<4x1xf32>
    %20 = vector.broadcast %19 : vector<4x1xf32> to vector<4x512xf32>
    %21 = arith.addf %18, %20 : vector<4x512xf32>
    %c0_18 = arith.constant 0 : index
    %c0_19 = arith.constant 0 : index
    %c0_20 = arith.constant 0 : index
    %22 = vector.load %arg7[%c0_18, %c0_19, %c0_20] : memref<1x4x512xf32, #tpu.memory_space<vmem>>, vector<1x4x512xf32>
    %23 = vector.shape_cast %22 : vector<1x4x512xf32> to vector<4x512xf32>
    %24 = vector.shape_cast %21 : vector<4x512xf32> to vector<1x4x512xf32>
    tpu.vector_store %arg7[%c0_18, %c0_19, %c0_20], %24 {strides = array<i32>} : memref<1x4x512xf32, #tpu.memory_space<vmem>>, vector<1x4x512xf32>,
    return
  }
  func.func @transform_0(%arg0: i32, %arg1: i32) -> (i32, i32, i32) {
    %c0_i32 = arith.constant 0 : i32
    %c0_i32_0 = arith.constant 0 : i32
    return %arg0, %c0_i32, %arg1 : i32, i32, i32
  }
  func.func @transform_1(%arg0: i32, %arg1: i32) -> (i32, i32) {
    %c0_i32 = arith.constant 0 : i32
    %c0_i32_0 = arith.constant 0 : i32
    %c0_i32_1 = arith.constant 0 : i32
    return %c0_i32, %c0_i32_0 : i32, i32
  }
  func.func @transform_2(%arg0: i32, %arg1: i32) -> (i32, i32) {
    %c0_i32 = arith.constant 0 : i32
    %c0_i32_0 = arith.constant 0 : i32
    %c0_i32_1 = arith.constant 0 : i32
    return %c0_i32, %c0_i32_0 : i32, i32
  }
  func.func @transform_3(%arg0: i32, %arg1: i32) -> (i32, i32) {
    %c0_i32 = arith.constant 0 : i32
    %c0_i32_0 = arith.constant 0 : i32
    %c0_i32_1 = arith.constant 0 : i32
    return %c0_i32, %c0_i32_0 : i32, i32
  }
  func.func @transform_4(%arg0: i32, %arg1: i32) -> (i32, i32) {
    %c0_i32 = arith.constant 0 : i32
    %c0_i32_0 = arith.constant 0 : i32
    %c0_i32_1 = arith.constant 0 : i32
    return %c0_i32, %c0_i32_0 : i32, i32
  }
  func.func @transform_5(%arg0: i32, %arg1: i32) -> (i32, i32, i32) {
    %c0_i32 = arith.constant 0 : i32
    %c0_i32_0 = arith.constant 0 : i32
    return %arg0, %c0_i32, %arg1 : i32, i32, i32
  }
}

</mosaic_0001>

<bundles_post_ra>
// kernel: conv_mlp_forward.1
= control target key start
LH: loop header
LB: loop body
LE: loop exit
PB: predicated region body
PF: predicated region fallthrough
CT: control target
= control target key end

     0   :  { %s884_s18 = smov 0   ;;  %s886_s19 = smov 0   ;;  %s942_s0 = inlined_call_operand.vmem [shape: f32[2,4,512], index: 0, kind: input, shape index: {}]   ;;  %s943_s1 = inlined_call_operand.vmem [shape: f32[16,4], index: 1, kind: input, shape index: {}]   ;;  %s944_s2 = inlined_call_operand.vmem [shape: f32[16,1], index: 2, kind: input, shape index: {}]   ;;  %s945_s3 = inlined_call_operand.vmem [shape: f32[4,16], index: 3, kind: input, shape index: {}]   ;;  %s946_s4 = inlined_call_operand.vmem [shape: f32[4,1], index: 4, kind: input, shape index: {}]   ;;  %s947_s5 = inlined_call_operand.vmem [shape: f32[2,4,512], index: 5, kind: output, shape index: {}]  }
   0x1   :  { %s888_s20 = smov 0  }
   0x2 LB: > { %s27_s21 = sadd.s32 1, %s845_s19  ;;  %p761_p0 = scmp.ge.s32.totalorder %s849_s20, 1  ;;  %s849_s20 = sphi %s888_s20, %s15_s20   ;;  %s845_s19 = sphi %s886_s19, %s949_s19   ;;  %s841_s18 = sphi %s884_s18, %s948_s18  }
   0x3   : > { %p29_p1 = scmp.ge.s32.totalorder %s27_s21, 2  ;;  %p208_p2 = scmp.lt.s32.totalorder %s849_s20, 3 }
   0x5   : > { %s951_s21 = smov (%p29_p1, %s27_s21), 0  ;;  %p209_p3 = pnand %p761_p0, %p208_p2 }
   0x6   : > { %p245_p4 = scmp.lt.s32.totalorder (!%p209_p3), %s841_s18, 1 }
   0x7   : > { %212 = sbr.rel (%p209_p3) target bundleno = 446 (0x1be), region = 40 }
   0xc   : > { %v851_v0 = vmov 0.0   ;;  %v269_v1 = vld [vmem:[%s944_s2 + $0x8] sm:$0xff]  ;;  %s953_s18 = smov (!%p245_p4, %s841_s18), 1  ;;  %v852_v2 = vmov 0   ;;  %v268_v3 = vld [vmem:[%s944_s2] sm:$0xff]  ;;  %vm291_vm0 = vcmask 1043456  }
   0xd   : > { %364 = vmatprep.mubr.f32.mxu0 %v851_v0  ;;  %441 = vmatprep.mubr.f32.mxu1 %v851_v0  ;;  %s778_s24 = sshll.u32 %s953_s18, 4  ;;  %v266_v8 = vld [vmem:[%s943_s1] sm:$0xff]  ;;  %vm284_vm1 = vcmask 31744   ;;  %v267_v9 = vld [vmem:[%s943_s1 + $0x8] sm:$0xff]  ;;  %vm495_vm2 = vcmask 130048  }
   0xe   : > { %807 = vset.pattern.permute.xlu0 %v852_v2  ;;  %808 = vset.pattern.permute.xlu1 %v852_v2  ;;  %s252_s29 = scalar_lea.vmem %s942_s0, %s778_s24  ;;  %v653_v10 = vld [vmem:[%s946_s4] sm:$0xf]  ;;  %s262_s15 = scalar_lea.vmem %s947_s5, %s778_s24 }
   0xf   : > { %277 = vperm.xlu0 %807, %v269_v1   ;;  %v264_v4 = vld [vmem:[%s252_s29] sm:$0xff]  ;;  %v265_v5 = vld [vmem:[%s252_s29 + $0x8] sm:$0xff]  ;;  %656 = vperm.xlu1 %808, %v653_v10  }
  0x10   : > { %v282_v6 = vcombine.high %v264_v4, %v264_v4  ;;  %v283_v7 = vcombine.high %v265_v5, %v265_v5 }
  0x12   : > { %766 = vmatprep.subr.msk.mxu0 %vm291_vm0, %v282_v6  ;;  %770 = vmatprep.subr.msk.mxu1 %vm291_vm0, %v283_v7  ;;  %v853_v6 = vmov 839922192  }
  0x13   : > { %272 = vperm.xlu0 %807, %v268_v3   ;;  %767 = vmatpush1.msk.msra.mxu0 %vm291_vm0, %v264_v4  ;;  %v494_v4 = vld [vmem:[%s945_s3] sm:$0xf]  ;;  %v659_v7 = vunpack.c.l.s4 %v853_v6 }
  0x14   : > { %771 = vmatpush1.msk.msra.mxu1 %vm291_vm0, %v265_v5  ;;  %768 = vmatmul.mubr.msk.f32.vlgmr.msra.gmra.mxu0 %vm284_vm1, %v266_v8 }
  0x15   : > { %772 = vmatmul.mubr.msk.f32.vlgmr.msra.gmra.mxu1 %vm284_vm1, %v266_v8  ;;  %370 = vmatprep.mubr.f32.mxu0 %v851_v0  ;;  %v661_v8 = vlaneseq }
  0x16   : > { %447 = vmatprep.mubr.f32.mxu1 %v851_v0 }
  0x17   : > { %v662_v10 = vshrl.u32 %v661_v8, 7 }
  0x18   : > { %769 = vmatmul.mubr.msk.f32.gmra.mxu0 %vm284_vm1, %v267_v9 }
  0x19   : > { %773 = vmatmul.mubr.msk.f32.gmra.mxu1 %vm284_vm1, %v267_v9  ;;  %563 = vmatprep.mubr.f32.mxu0 %v851_v0  ;;  %v660_v9 = vunpack.c.0.s8 %v659_v7 }
  0x1a   : > { %634 = vmatprep.mubr.f32.mxu1 %v851_v0 }
  0x8a   : > { %v278_v11 = vpop.permute.xlu0 %277 }
  0x8e   : > { %v273_v12 = vpop.permute.xlu0 %272 }
  0xd4   : > { %v366_v13 = vpop.f32.mrf.mxu0 }
  0xd5   : > { %v443_v14 = vpop.f32.mrf.mxu1  ;;  %v367_v15 = vadd.f32 %v366_v13, %v273_v12 }
  0xd6   : > { %v444_v16 = vadd.f32 %v443_v14, %v273_v12  ;;  %v368_v17 = vpop.f32.mrf.mxu0 }
  0xd7   : > { %v445_v18 = vpop.f32.mrf.mxu1  ;;  %v462_v19 = vmul.f32 0.70710677, %v367_v15  ;;  %v369_v21 = vadd.f32 %v368_v17, %v273_v12  ;;  %v454_v59 = vmul.f32 0.5, %v367_v15 }
  0xd8   : > { %v464_v20 = vmul.f32 0.70710677, %v444_v16  ;;  %v446_v22 = vadd.f32 %v445_v18, %v273_v12  ;;  %v372_v23 = vpop.f32.mrf.mxu0  ;;  %v456_v63 = vmul.f32 0.5, %v444_v16  ;;  %v657_v12 = vpop.permute.xlu1 %656 }
  0xd9   : > { %v449_v24 = vpop.f32.mrf.mxu1  ;;  %v373_v25 = vadd.f32 %v372_v23, %v278_v11  ;;  %811 = verf.f32 %v462_v19  ;;  %v463_v27 = vmul.f32 0.70710677, %v369_v21  ;;  %v455_v56 = vmul.f32 0.5, %v369_v21 }
  0xda   : > { %v450_v26 = vadd.f32 %v449_v24, %v278_v11  ;;  %v374_v28 = vpop.f32.mrf.mxu0  ;;  %813 = verf.f32 %v464_v20  ;;  %v465_v30 = vmul.f32 0.70710677, %v446_v22  ;;  %v457_v60 = vmul.f32 0.5, %v446_v22 }
  0xdb   : > { %v451_v29 = vpop.f32.mrf.mxu1  ;;  %v466_v31 = vmul.f32 0.70710677, %v373_v25  ;;  %815 = verf.f32 %v463_v27  ;;  %v375_v33 = vadd.f32 %v374_v28, %v278_v11  ;;  %v458_v44 = vmul.f32 0.5, %v373_v25 }
  0xdc   : > { %v468_v32 = vmul.f32 0.70710677, %v450_v26  ;;  %v452_v34 = vadd.f32 %v451_v29, %v278_v11  ;;  %817 = verf.f32 %v465_v30  ;;  %v460_v57 = vmul.f32 0.5, %v450_v26 }
  0xdd   : > { %819 = verf.f32 %v466_v31  ;;  %v467_v35 = vmul.f32 0.70710677, %v375_v33  ;;  %v459_v48 = vmul.f32 0.5, %v375_v33  ;;  %v663_v11 = vsub.s32 %v660_v9, %v662_v10 }
  0xde   : > { %821 = verf.f32 %v468_v32  ;;  %v469_v36 = vmul.f32 0.70710677, %v452_v34  ;;  %v461_v52 = vmul.f32 0.5, %v452_v34 }
  0xdf   : > { %823 = verf.f32 %v467_v35  ;;  %v664_v15 = vrot.slane %v657_v12, %v663_v11 }
  0xe0   : > { %825 = verf.f32 %v469_v36 }
  0xe6   : > { %v812_v37 = vpop.eup %811 }
  0xe7   : > { %v814_v38 = vpop.eup %813  ;;  %v478_v51 = vadd.f32 1.0, %v812_v37 }
  0xe8   : > { %v816_v39 = vpop.eup %815  ;;  %v480_v55 = vadd.f32 1.0, %v814_v38 }
  0xe9   : > { %v818_v40 = vpop.eup %817  ;;  %v479_v50 = vadd.f32 1.0, %v816_v39  ;;  %v486_v2 = vmul.f32 %v478_v51, %v454_v59 }
  0xea   : > { %v820_v41 = vpop.eup %819  ;;  %v481_v54 = vadd.f32 1.0, %v818_v40  ;;  %v488_v5 = vmul.f32 %v480_v55, %v456_v63 }
  0xeb   : > { %v822_v42 = vpop.eup %821  ;;  %v482_v45 = vadd.f32 1.0, %v820_v41  ;;  %v487_v1 = vmul.f32 %v479_v50, %v455_v56 }
  0xec   : > { %v824_v43 = vpop.eup %823  ;;  %v484_v47 = vadd.f32 1.0, %v822_v42  ;;  %v489_v3 = vmul.f32 %v481_v54, %v457_v60 }
  0xed   : > { %v826_v46 = vpop.eup %825  ;;  %v483_v49 = vadd.f32 1.0, %v824_v43  ;;  %v490_v61 = vmul.f32 %v482_v45, %v458_v44 }
  0xee   : > { %v485_v53 = vadd.f32 1.0, %v826_v46  ;;  %v492_v0 = vmul.f32 %v484_v47, %v460_v57 }
  0xef   : > { %v491_v58 = vmul.f32 %v483_v49, %v459_v48 }
  0xf0   : > { %v493_v62 = vmul.f32 %v485_v53, %v461_v52 }
  0xf1   : > { %527 = vmatprep.subr.mxu0 %v491_v58 }
  0xf2   : > { %598 = vmatprep.subr.mxu1 %v493_v62  ;;  %528 = vmatpush1.msra.mxu0 %v490_v61 }
  0xf3   : > { %599 = vmatpush1.msra.mxu1 %v492_v0  ;;  %529 = vmatprep.subr.mxu0 %v487_v1 }
  0xf4   : > { %600 = vmatprep.subr.mxu1 %v489_v3  ;;  %530 = vmatpush1.msra.mxu0 %v486_v2 }
  0xf5   : > { %601 = vmatpush1.msra.mxu1 %v488_v5  ;;  %774 = vmatmul.mubr.msk.f32.vlgmr.msra.gmra.mxu0 %vm495_vm2, %v494_v4 }
  0xf6   : > { %775 = vmatmul.mubr.msk.f32.vlgmr.msra.gmra.mxu1 %vm495_vm2, %v494_v4 }
 0x1b5   : > { %v565_v13 = vpop.f32.mrf.mxu0 }
 0x1b6   : > { %v636_v14 = vpop.f32.mrf.mxu1 }
 0x1b7   : > { %v567_v16 = vpop.f32.mrf.mxu0 }
 0x1b8   : > { %v645_v17 = vcombine.low %v565_v13, %v567_v16  ;;  %v638_v18 = vpop.f32.mrf.mxu1 }
 0x1b9   : > { %v646_v19 = vcombine.low %v636_v14, %v638_v18 }
 0x1ba   : > { %v666_v20 = vadd.f32 %v664_v15, %v645_v17 }
 0x1bb   : > { %v667_v21 = vadd.f32 %v664_v15, %v646_v19 }
 0x1bc   : > { %668 = vst [vmem:[%s262_s15] sm:$0xff] %v666_v20 }
 0x1bd   : > { %669 = vst [vmem:[%s262_s15 + $0x8] sm:$0xff] %v667_v21 }
 0x1be PF: > { %s15_s20 = sadd.s32 1, %s849_s20   ;;  %s948_s18 = smov %s845_s19 }
 0x1bf   : > { %p12_p5 = scmp.ge.s32.totalorder %s15_s20, 4   ;;  %s949_s19 = smov %s951_s21 }
 0x1c1   :  { %14 = sbr.rel (!%p12_p5) target bundleno = 2 (0x2), region = 70 }

</bundles_post_ra>
